<compile_context>
chip_gen: v7x
topology: tpu7x:2x2x1
jax: 0.10.0
libtpu: 0.0.40
codegen_flags: <defaults>
</compile_context>

<pallas_src>
import functools

import jax
import jax.numpy as jnp
from jax.experimental import pallas as pl
from jax.experimental.pallas import tpu as pltpu

H1, H2, H3 = 256, 128, 64  # hidden widths of the critic MLP


def _round_up(n, m):
    return ((n + m - 1) // m) * m


def critic_kernel(x_ref, w_ref, t_ref, out_ref, *, s_pad):
    """One batch tile of the critic MLP.

    x_ref   : (TB, s_pad) f32   state block
    w_ref   : (s_pad + 384, 256) bf16 packed weights
                rows [0, s_pad)          W1 (s_pad, 256), rows >= s_dim zero
                rows [s_pad, s_pad+256)  W2 (256, x), cols [0,128) valid
                rows [.., s_pad+384)     W3 (128, x), cols [0,64)  valid
    t_ref   : (8, 256) f32 tail: row0 = W4^T (64 valid), row1 = b1,
                row2 = b2 (128 valid), row3 = b3 (64 valid), row4[0] = b4
    out_ref : (1, TB) f32   lane-dense value row
    """
    r2 = s_pad
    r3 = s_pad + H1
    r4 = s_pad + H1 + H2

    # bf16 operands for the MXU; accumulate in f32.
    x = x_ref[...].astype(jnp.bfloat16)          # (TB, s_pad)
    w1 = w_ref[0:r2, :]                          # (s_pad, 256) bf16
    w2 = w_ref[r2:r3, 0:H2]                      # (256, 128)   bf16 (valid cols only)
    w3 = w_ref[r3:r4, 0:H3]                      # (128, 64)    bf16 (valid cols only)

    w4 = t_ref[0:1, 0:H3]                        # (1, 64)  f32
    b1 = t_ref[1:2, 0:H1]                        # (1, 256) f32
    b2 = t_ref[2:3, 0:H2]                        # (1, 128) f32
    b3 = t_ref[3:4, 0:H3]                        # (1, 64)  f32
    b4 = t_ref[4:5, 0:1]                         # (1, 1)   f32

    # Layer 1: (TB, s_pad) @ (s_pad, 256) -> ReLU   (f32 bias/ReLU)
    h = jnp.maximum(
        jnp.dot(x, w1, preferred_element_type=jnp.float32) + b1, 0.0)
    # Layer 2: (TB, 256) @ (256, 128) -> ReLU
    h = jnp.maximum(
        jnp.dot(h.astype(jnp.bfloat16), w2,
                preferred_element_type=jnp.float32) + b2, 0.0)
    # Layer 3: (TB, 128) @ (128, 64) -> ReLU
    h = jnp.maximum(
        jnp.dot(h.astype(jnp.bfloat16), w3,
                preferred_element_type=jnp.float32) + b3, 0.0)
    # Value head (N=1): VPU multiply + XLU lane reduce over 64 lanes, no MXU.
    v = jnp.sum(h * w4, axis=-1, keepdims=True) + b4        # (TB, 1)
    # Lane-dense store: transpose the value column onto the lane axis.
    out_ref[...] = jnp.transpose(v).astype(out_ref.dtype)   # (1, TB)


def pack_critic_params(params, s_dim):
    """Pack params into a bf16 weight slab + a small f32 tail.

    Returns (w_packed bf16 (s_pad+384, 256), tail f32 (8, 256), s_pad).
    s_pad is rounded to 16 so every in-kernel row slice of the bf16 slab is
    sublane-tile aligned.
    """
    s_pad = _round_up(max(s_dim, 1), 16)
    w1 = jnp.pad(params["w1"], ((0, s_pad - s_dim), (0, 0)))   # (s_pad, 256)
    w2 = jnp.pad(params["w2"], ((0, 0), (0, H1 - H2)))         # (256, 256) cols>=128 unused
    w3 = jnp.pad(params["w3"], ((0, 0), (0, H1 - H3)))         # (128, 256) cols>=64  unused
    w_packed = jnp.concatenate([w1, w2, w3], axis=0).astype(jnp.bfloat16)

    tail = jnp.zeros((8, H1), dtype=jnp.float32)
    tail = tail.at[0, :H3].set(params["w4"][:, 0])             # W4^T row
    tail = tail.at[1, :H1].set(params["b1"][0])
    tail = tail.at[2, :H2].set(params["b2"][0])
    tail = tail.at[3, :H3].set(params["b3"][0])
    tail = tail.at[4, 0].set(params["b4"][0, 0])
    return w_packed, tail, s_pad


def critic_forward(x, w_packed, tail, s_pad, *, block_b=1024):
    """x: (B, s_dim) f32.  Returns (B, 1) f32 values."""
    B, s_dim = x.shape
    if s_dim < s_pad:
        # No-op whenever s_dim is already a multiple of 16 (e.g. the demo);
        # otherwise zero-pad the feature axis to match the packed W1 rows.
        x = jnp.pad(x, ((0, 0), (0, s_pad - s_dim)))

    # Batch tile: large to amortize per-grid-step overhead; no batch padding
    # of x (Pallas partial tail blocks handle B % tb != 0).
    tb = min(block_b, _round_up(B, 8))
    # v7x has 2 TensorCores: split a single oversized tile so the 'parallel'
    # batch axis can shard across both cores (keep tb a multiple of 128).
    if pl.cdiv(B, tb) == 1 and tb > 256 and tb % 256 == 0:
        tb //= 2
    num_tiles = pl.cdiv(B, tb)

    kernel = functools.partial(critic_kernel, s_pad=s_pad)
    out = pl.pallas_call(
        kernel,
        out_shape=jax.ShapeDtypeStruct((1, num_tiles * tb), jnp.float32),
        grid=(num_tiles,),
        in_specs=[
            pl.BlockSpec((tb, s_pad), lambda i: (i, 0)),
            # Weights / tail: constant block index -> VMEM-resident across steps.
            pl.BlockSpec(w_packed.shape, lambda i: (0, 0)),
            pl.BlockSpec(tail.shape, lambda i: (0, 0)),
        ],
        out_specs=pl.BlockSpec((1, tb), lambda i: (0, i)),
        compiler_params=pltpu.CompilerParams(
            dimension_semantics=("parallel",)),
    )(x, w_packed, tail)
    # Lane-dense (1, num_tiles*tb) row -> (B, 1) column; drop any tail garbage.
    return out[0, :B].reshape(B, 1)


def init_critic_params(key, s_dim):
    """Mirror the PyTorch module: weights ~ N(0, 0.01),
    biases ~ U(-1/sqrt(fan_in), 1/sqrt(fan_in)) (nn.Linear default).
    Weights are stored transposed vs PyTorch, i.e. (in_features, out_features)."""
    dims = [(s_dim, H1), (H1, H2), (H2, H3), (H3, 1)]
    params = {}
    for i, (fan_in, fan_out) in enumerate(dims, start=1):
        key, kw, kb = jax.random.split(key, 3)
        params[f"w{i}"] = (0.01 * jax.random.normal(kw, (fan_in, fan_out))
                           ).astype(jnp.float32)
        bound = 1.0 / jnp.sqrt(jnp.float32(fan_in))
        params[f"b{i}"] = jax.random.uniform(
            kb, (1, fan_out), minval=-bound, maxval=bound, dtype=jnp.float32)
    return params


def critic_ref(x, params):
    """Pure-JAX f32 reference for correctness checking (unpacked params)."""
    h = jax.nn.relu(x @ params["w1"] + params["b1"])
    h = jax.nn.relu(h @ params["w2"] + params["b2"])
    h = jax.nn.relu(h @ params["w3"] + params["b3"])
    return h @ params["w4"] + params["b4"]


# TODO(synk): loss_func / torch.distributions.Normal are training-time
# utilities outside the forward pass and are not implemented as kernels.

if __name__ == "__main__":
    key = jax.random.PRNGKey(0)
    s_dim = 32   # state-vector dimension
    a_dim = 4    # unused by the value head, kept for parity with the module
    B = 8        # batch of states

    kx, kp = jax.random.split(key)
    x = jax.random.normal(kx, (B, s_dim), dtype=jnp.float32)
    params = init_critic_params(kp, s_dim)
    w_packed, tail, s_pad = pack_critic_params(params, s_dim)

    value = critic_forward(x, w_packed, tail, s_pad)
    value = jax.block_until_ready(value)

    expected = critic_ref(x, params)
    assert value.shape == (B, 1)
    # bf16 MXU inputs -> loosened parity tolerance vs the f32 reference.
    assert jnp.allclose(value, expected, atol=2e-2, rtol=2e-2), \
        "mismatch vs JAX reference"

    print("KERNEL_OK")
</pallas_src>

<mosaic_0001>
module attributes {stable_mosaic.version = 11 : i64} {
  func.func @critic_kernel(%arg0: i32, %arg1: memref<8x32xf32, #tpu.memory_space<vmem>>, %arg2: memref<416x256xbf16, #tpu.memory_space<vmem>>, %arg3: memref<8x256xf32, #tpu.memory_space<vmem>>, %arg4: memref<1x8xf32, #tpu.memory_space<vmem>>) attributes {dimension_semantics = [#tpu.dimension_semantics<parallel>], iteration_bounds = array<i64: 1>, scalar_prefetch = 0 : i64, scratch_operands = 0 : i64, tpu.core_type = #tpu.core_type<tc>, window_params = [{transform_indices = @transform_0, window_bounds = array<i64: 8, 32>}, {pipeline_mode = #tpu.pipeline_mode<synchronous>, transform_indices = @transform_1, window_bounds = array<i64: 416, 256>}, {pipeline_mode = #tpu.pipeline_mode<synchronous>, transform_indices = @transform_2, window_bounds = array<i64: 8, 256>}, {transform_indices = @transform_3, window_bounds = array<i64: 1, 8>}]} {
    %c0 = arith.constant 0 : index
    %c0_0 = arith.constant 0 : index
    %0 = vector.load %arg1[%c0, %c0_0] : memref<8x32xf32, #tpu.memory_space<vmem>>, vector<8x32xf32>
    %1 = arith.truncf %0 : vector<8x32xf32> to vector<8x32xbf16>
    %c0_1 = arith.constant 0 : index
    %c0_2 = arith.constant 0 : index
    %2 = vector.load %arg2[%c0_1, %c0_2] : memref<416x256xbf16, #tpu.memory_space<vmem>>, vector<32x256xbf16>
    %c32 = arith.constant 32 : index
    %c0_3 = arith.constant 0 : index
    %3 = vector.load %arg2[%c32, %c0_3] : memref<416x256xbf16, #tpu.memory_space<vmem>>, vector<256x128xbf16>
    %c288 = arith.constant 288 : index
    %c0_4 = arith.constant 0 : index
    %4 = vector.load %arg2[%c288, %c0_4] : memref<416x256xbf16, #tpu.memory_space<vmem>>, vector<128x64xbf16>
    %c0_5 = arith.constant 0 : index
    %c0_6 = arith.constant 0 : index
    %5 = vector.load %arg3[%c0_5, %c0_6] : memref<8x256xf32, #tpu.memory_space<vmem>>, vector<1x64xf32>
    %c1 = arith.constant 1 : index
    %c0_7 = arith.constant 0 : index
    %6 = vector.load %arg3[%c1, %c0_7] : memref<8x256xf32, #tpu.memory_space<vmem>>, vector<1x256xf32>
    %c2 = arith.constant 2 : index
    %c0_8 = arith.constant 0 : index
    %7 = vector.load %arg3[%c2, %c0_8] : memref<8x256xf32, #tpu.memory_space<vmem>>, vector<1x128xf32>
    %c3 = arith.constant 3 : index
    %c0_9 = arith.constant 0 : index
    %8 = vector.load %arg3[%c3, %c0_9] : memref<8x256xf32, #tpu.memory_space<vmem>>, vector<1x64xf32>
    %c4 = arith.constant 4 : index
    %c0_10 = arith.constant 0 : index
    %9 = vector.load %arg3[%c4, %c0_10] : memref<8x256xf32, #tpu.memory_space<vmem>>, vector<1x1xf32>
    %cst = arith.constant dense<0.000000e+00> : vector<8x256xf32>
    %10 = tpu.matmul %1, %2, %cst {dimension_numbers = #tpu.dot_dimension_numbers<[1], [0], [0], [1], [0, 0, 1, 1], [], []>} : vector<8x32xbf16>, vector<32x256xbf16>, vector<8x256xf32> -> vector<8x256xf32>
    %11 = vector.broadcast %6 : vector<1x256xf32> to vector<8x256xf32>
    %12 = arith.addf %10, %11 : vector<8x256xf32>
    %cst_11 = arith.constant 0.000000e+00 : f32
    %13 = vector.broadcast %cst_11 : f32 to vector<8x256xf32>
    %14 = arith.maximumf %12, %13 : vector<8x256xf32>
    %15 = arith.truncf %14 : vector<8x256xf32> to vector<8x256xbf16>
    %cst_12 = arith.constant dense<0.000000e+00> : vector<8x128xf32>
    %16 = tpu.matmul %15, %3, %cst_12 {dimension_numbers = #tpu.dot_dimension_numbers<[1], [0], [0], [1], [0, 0, 1, 1], [], []>} : vector<8x256xbf16>, vector<256x128xbf16>, vector<8x128xf32> -> vector<8x128xf32>
    %17 = vector.broadcast %7 : vector<1x128xf32> to vector<8x128xf32>
    %18 = arith.addf %16, %17 : vector<8x128xf32>
    %cst_13 = arith.constant 0.000000e+00 : f32
    %19 = vector.broadcast %cst_13 : f32 to vector<8x128xf32>
    %20 = arith.maximumf %18, %19 : vector<8x128xf32>
    %21 = arith.truncf %20 : vector<8x128xf32> to vector<8x128xbf16>
    %cst_14 = arith.constant dense<0.000000e+00> : vector<8x64xf32>
    %22 = tpu.matmul %21, %4, %cst_14 {dimension_numbers = #tpu.dot_dimension_numbers<[1], [0], [0], [1], [0, 0, 1, 1], [], []>} : vector<8x128xbf16>, vector<128x64xbf16>, vector<8x64xf32> -> vector<8x64xf32>
    %23 = vector.broadcast %8 : vector<1x64xf32> to vector<8x64xf32>
    %24 = arith.addf %22, %23 : vector<8x64xf32>
    %cst_15 = arith.constant 0.000000e+00 : f32
    %25 = vector.broadcast %cst_15 : f32 to vector<8x64xf32>
    %26 = arith.maximumf %24, %25 : vector<8x64xf32>
    %27 = vector.broadcast %5 : vector<1x64xf32> to vector<8x64xf32>
    %28 = arith.mulf %26, %27 : vector<8x64xf32>
    %cst_16 = arith.constant dense<0.000000e+00> : vector<8xf32>
    %29 = vector.multi_reduction <add>, %28, %cst_16 [1] : vector<8x64xf32> to vector<8xf32>
    %30 = vector.shape_cast %29 : vector<8xf32> to vector<8x1xf32>
    %31 = vector.broadcast %9 : vector<1x1xf32> to vector<8x1xf32>
    %32 = arith.addf %30, %31 : vector<8x1xf32>
    %33 = tpu.transpose %32, [1, 0] : vector<8x1xf32> -> vector<1x8xf32>
    %c0_17 = arith.constant 0 : index
    %c0_18 = arith.constant 0 : index
    %34 = vector.load %arg4[%c0_17, %c0_18] : memref<1x8xf32, #tpu.memory_space<vmem>>, vector<1x8xf32>
    tpu.vector_store %arg4[%c0_17, %c0_18], %33 {strides = array<i32>} : memref<1x8xf32, #tpu.memory_space<vmem>>, vector<1x8xf32>,
    return
  }
  func.func @transform_0(%arg0: i32) -> (i32, i32) {
    %c0_i32 = arith.constant 0 : i32
    %c0_i32_0 = arith.constant 0 : i32
    return %arg0, %c0_i32 : i32, i32
  }
  func.func @transform_1(%arg0: i32) -> (i32, i32) {
    %c0_i32 = arith.constant 0 : i32
    %c0_i32_0 = arith.constant 0 : i32
    %c0_i32_1 = arith.constant 0 : i32
    return %c0_i32, %c0_i32_0 : i32, i32
  }
  func.func @transform_2(%arg0: i32) -> (i32, i32) {
    %c0_i32 = arith.constant 0 : i32
    %c0_i32_0 = arith.constant 0 : i32
    %c0_i32_1 = arith.constant 0 : i32
    return %c0_i32, %c0_i32_0 : i32, i32
  }
  func.func @transform_3(%arg0: i32) -> (i32, i32) {
    %c0_i32 = arith.constant 0 : i32
    %c0_i32_0 = arith.constant 0 : i32
    return %c0_i32, %arg0 : i32, i32
  }
}

</mosaic_0001>

<bundles_post_ra>
// kernel: tpu_custom_call.1
= control target key start
LH: loop header
LB: loop body
LE: loop exit
PB: predicated region body
PF: predicated region fallthrough
CT: control target
= control target key end

     0   :  { %8 = vsyncpa [#allocation3], 0  ;;  %s766_s0 = inlined_call_operand.hbm [shape: f32[8,32], index: 0, kind: input, shape index: {}]   ;;  %s767_s1 = inlined_call_operand.hbm [shape: bf16[416,256], index: 1, kind: input, shape index: {}]   ;;  %s768_s2 = inlined_call_operand.hbm [shape: f32[8,256], index: 2, kind: input, shape index: {}]   ;;  %s769_s3 = inlined_call_operand.hbm [shape: f32[1,8], index: 3, kind: output, shape index: {}]  }
   0x1   :  { %9 = vsyncpa [#allocation6], 0 }
   0x2   :  { %10 = vsyncpa [#allocation4], 0  ;;  %s689_s12 = smov [#allocation5]   ;;  %s595_s16 = scalar_lea.hbm %s767_s1, 6656 }
   0x3   :  { %s26_s13 = sshll.u32 %s689_s12, 4  ;;  %p596_p0 = scmp.ne.s32.totalorder %s767_s1, %s595_s16  ;;  %s27_s13 = int_to_ptr.vmem [resolvable:$true] %s26_s13 }
   0x4   :  { %p599_p1 = scmp.lt.u32.totalorder %s595_s16, %s767_s1 }
   0x6   :  { %p601_p2 = pnand %p599_p1, %p596_p0 }
   0x8   :  { %604 = shalt.err (!%p601_p2)
}
   0x9   :  { %s605_s21 = scalar_lea.vmem %s27_s13, 6656  ;;  %p610_p4 = scmp.lt.s32.totalorder %s27_s13, %s27_s13 }
   0xa   :  { %p606_p3 = scmp.ne.s32.totalorder %s27_s13, %s605_s21  ;;  %p611_p5 = scmp.lt.s32.totalorder %s605_s21, %s605_s21 }
   0xc   :  { %p612_p6 = por %p611_p5, %p610_p4 }
   0xe   :  { %p613_p7 = pnand %p612_p6, %p606_p3 }
  0x10   :  { %616 = shalt.err (!%p613_p7)
}
  0x11   :  { %s690_s22 = smov 128   ;;  %s691_s23 = smov 8  }
  0x12   :  { %32 = dma.hbm_to_vmem [thread:$0]  %s767_s1, 6656, %s27_s13, [#allocation6], %s690_s22, %s690_s22, %s691_s23  }
  0x13   :  { %s692_s26 = smov [#allocation2]   ;;  %s693_s28 = smov [#allocation7]  }
  0x14   :  { %s17_s27 = sshll.u32 %s692_s26, 4  ;;  %s39_s29 = sshll.u32 %s693_s28, 4  ;;  %s18_s27 = int_to_ptr.vmem [resolvable:$true] %s17_s27  ;;  %s40_s29 = int_to_ptr.vmem [resolvable:$true] %s39_s29 }
  0x15   :  { %s617_s5 = scalar_lea.hbm %s766_s0, 128 }
  0x16   :  { %p618_p8 = scmp.ne.s32.totalorder %s766_s0, %s617_s5  ;;  %p621_p9 = scmp.lt.u32.totalorder %s617_s5, %s766_s0 }
  0x18   :  { %p623_p10 = pnand %p621_p9, %p618_p8 }
  0x1a   :  { %626 = shalt.err (!%p623_p10)
}
  0x1b   :  { %s627_s1 = scalar_lea.vmem %s18_s27, 128  ;;  %p632_p12 = scmp.lt.s32.totalorder %s18_s27, %s18_s27 }
  0x1c   :  { %p628_p11 = scmp.ne.s32.totalorder %s18_s27, %s627_s1  ;;  %p633_p13 = scmp.lt.s32.totalorder %s627_s1, %s627_s1 }
  0x1e   :  { %p634_p0 = por %p633_p13, %p632_p12 }
  0x20   :  { %p635_p1 = pnand %p634_p0, %p628_p11 }
  0x22   :  { %638 = shalt.err (!%p635_p1)
}
  0x23   :  { %20 = dma.hbm_to_vmem [thread:$0]  %s766_s0, 128, %s18_s27, [#allocation3]  }
  0x24   :  { %s639_s14 = scalar_lea.hbm %s768_s2, 256 }
  0x25   :  { %p640_p2 = scmp.ne.s32.totalorder %s768_s2, %s639_s14  ;;  %p643_p3 = scmp.lt.u32.totalorder %s639_s14, %s768_s2 }
  0x27   :  { %p645_p4 = pnand %p643_p3, %p640_p2 }
  0x29   :  { %648 = shalt.err (!%p645_p4)
}
  0x2a   :  { %s649_s19 = scalar_lea.vmem %s40_s29, 256  ;;  %p654_p6 = scmp.lt.s32.totalorder %s40_s29, %s40_s29 }
  0x2b   :  { %p650_p5 = scmp.ne.s32.totalorder %s40_s29, %s649_s19  ;;  %p655_p7 = scmp.lt.s32.totalorder %s649_s19, %s649_s19 }
  0x2d   :  { %p656_p8 = por %p655_p7, %p654_p6 }
  0x2f   :  { %p657_p9 = pnand %p656_p8, %p650_p5 }
  0x31   :  { %660 = shalt.err (!%p657_p9)
}
  0x32   :  { %42 = dma.hbm_to_vmem [thread:$0]  %s768_s2, 256, %s40_s29, [#allocation6]  }
  0x33   :  { %683 = dma.done.wait [#allocation3], 128  }
  0x34   :  { %684 = vsyncadd [#allocation3], 4294967168 }
  0x35   :  { %685 = dma.done.wait [#allocation6], 6912  }
  0x36   :  { %686 = vsyncadd [#allocation6], 4294960384  ;;  %v694_v0 = vmov 0   ;;  %v565_v1 = vld [vmem:[#allocation5 + $0x4] ss:$8 sps:$4 sm:$0xff]   ;;  %v53_v5 = vld [vmem:[#allocation2] sm:$0xff]  ;;  %v114_v30 = vlaneseq }
  0x37   :  { %180 = vmatprep.mubr.bf16.mxu0 %v694_v0  ;;  %v567_v2 = vld [vmem:[#allocation5] ss:$8 sps:$4 sm:$0xff]   ;;  %148 = vmatprep.subr.bf16.mxu0 %v565_v1  ;;  %v568_v3 = vld [vmem:[#allocation5 + $0x14] ss:$8 sps:$4 sm:$0xff]   ;;  %v570_v4 = vld [vmem:[#allocation5 + $0x10] ss:$8 sps:$4 sm:$0xff]   ;;  %v54_v9 = vpack.c.bf16 %v53_v5, %v53_v5 }
  0x38   :  { %vm144_vm0 = vcmask 261120   ;;  %149 = vmatpush1.bf16.msra.mxu0 %v567_v2  ;;  %v571_v6 = vld [vmem:[#allocation5 + $0xa0] ss:$8 sps:$4 sm:$0xff]   ;;  %v573_v8 = vld [vmem:[#allocation5 + $0xb0] ss:$8 sps:$4 sm:$0xff]   ;;  %v695_v24 = vmov 0.0  }
  0x39   :  { %150 = vmatprep.subr.bf16.mxu0 %v568_v3  ;;  %v572_v7 = vld [vmem:[#allocation5 + $0x20] ss:$8 sps:$4 sm:$0xff]   ;;  %505 = vmatprep.subr.bf16.mxu1 %v571_v6  ;;  %v574_v10 = vld [vmem:[#allocation5 + $0x30] ss:$8 sps:$4 sm:$0xff]   ;;  %v115_v31 = vshrl.u32 %v114_v30, 7  ;;  %vm696_vm1 = vmmov 0  }
  0x3a   :  { %506 = vmatpush3.bf16.msra.mxu1 %v572_v7  ;;  %v575_v11 = vld [vmem:[#allocation5 + $0xc0] ss:$8 sps:$4 sm:$0xff]   ;;  %v577_v13 = vld [vmem:[#allocation5 + $0xd0] ss:$8 sps:$4 sm:$0xff]   ;;  %vm421_vm2 = vcmask 523264   ;;  %s697_s2 = smov [#allocation8]  }
  0x3b   :  { %507 = vmatprep.subr.bf16.mxu1 %v573_v8  ;;  %v576_v12 = vld [vmem:[#allocation5 + $0x40] ss:$8 sps:$4 sm:$0xff]   ;;  %v578_v14 = vld [vmem:[#allocation5 + $0x50] ss:$8 sps:$4 sm:$0xff]   ;;  %v116_v32 = vsub.s32 0, %v115_v31  ;;  %v120_v34 = vsub.s32 1, %v115_v31 }
  0x3c   :  { %151 = vmatpush1.bf16.msra.mxu0 %v570_v4  ;;  %v579_v15 = vld [vmem:[#allocation5 + $0xe0] ss:$8 sps:$4 sm:$0xff]   ;;  %v581_v17 = vld [vmem:[#allocation5 + $0xf0] ss:$8 sps:$4 sm:$0xff]   ;;  %v112_v4 = vld [vmem:[#allocation7 + $0x4] ss:$0 sm:$0xff] }
  0x3d   :  { %v580_v16 = vld [vmem:[#allocation5 + $0x60] ss:$8 sps:$4 sm:$0xff]   ;;  %v582_v18 = vld [vmem:[#allocation5 + $0x70] ss:$8 sps:$4 sm:$0xff]   ;;  %536 = vmatprep.subr.bf16.mxu0 %v695_v24  ;;  %s466_s21 = sshll.u32 %s697_s2, 4  ;;  %vm458_vm3 = vcmask 57344   ;;  %s467_s21 = int_to_ptr.vmem [resolvable:$true] %s466_s21 }
  0x3e   :  { %508 = vmatpush3.bf16.msra.mxu1 %v574_v10  ;;  %v583_v19 = vld [vmem:[#allocation5 + $0x100] ss:$8 sps:$4 sm:$0xff]   ;;  %v585_v21 = vld [vmem:[#allocation5 + $0x110] ss:$8 sps:$4 sm:$0xff]   ;;  %s661_s22 = scalar_lea.vmem %s467_s21, 16  ;;  %s665_s23 = scalar_lea.vmem %s467_s21, 32 }
  0x3f   :  { %480 = vmatmul.mubr.msk.bf16.vlgmr.msra.gmra.mrb[0].mxu0 %vm144_vm0, %v54_v9  ;;  %509 = vmatprep.subr.bf16.mxu1 %v575_v11  ;;  %v584_v20 = vld [vmem:[#allocation5 + $0x80] ss:$8 sps:$4 sm:$0xff]   ;;  %v586_v22 = vld [vmem:[#allocation5 + $0x90] ss:$8 sps:$4 sm:$0xff]   ;;  %p662_p10 = scmp.ne.s32.totalorder %s467_s21, %s661_s22  ;;  %p666_p11 = scmp.lt.s32.totalorder %s467_s21, %s467_s21 }
  0x40   :  { %v587_v23 = vld [vmem:[#allocation5 + $0x120] ss:$8 sps:$4 sm:$0xff]   ;;  %v588_v25 = vld [vmem:[#allocation5 + $0x130] ss:$8 sps:$4 sm:$0xff]   ;;  %552 = vmatprep.mubr.msk.bf16.mxu0 %vm696_vm1, %v695_v24  ;;  %p667_p12 = scmp.lt.s32.totalorder %s665_s23, %s661_s22 }
  0x41   :  { %537 = vmatpush3.bf16.msra.mxu0 %v587_v23  ;;  %v589_v26 = vld [vmem:[#allocation5 + $0x140] ss:$8 sps:$4 sm:$0xff]   ;;  %v590_v27 = vld [vmem:[#allocation5 + $0x150] ss:$8 sps:$4 sm:$0xff]  }
  0x42   :  { %510 = vmatpush3.bf16.msra.mxu1 %v576_v12  ;;  %538 = vmatprep.subr.bf16.mxu0 %v695_v24  ;;  %v591_v28 = vld [vmem:[#allocation5 + $0x160] ss:$8 sps:$4 sm:$0xff]   ;;  %v592_v29 = vld [vmem:[#allocation5 + $0x170] ss:$8 sps:$4 sm:$0xff]   ;;  %p668_p13 = por %p667_p12, %p666_p11 }
  0x43   :  { %511 = vmatprep.subr.bf16.mxu1 %v577_v13  ;;  %v109_v33 = vld [vmem:[#allocation7 + $0x1] ss:$8 sm:$0x3]  ;;  %v594_v48 = vld [vmem:[#allocation5 + $0x190] ss:$8 sps:$4 sm:$0xff]  }
  0x44   :  { %v117_v35 = vrot.slane %v109_v33, %v116_v32  ;;  %v121_v36 = vrot.slane %v109_v33, %v120_v34  ;;  %v593_v47 = vld [vmem:[#allocation5 + $0x180] ss:$8 sps:$4 sm:$0xff]   ;;  %p669_p0 = pnand %p668_p13, %p662_p10 }
  0x45   :  { %539 = vmatpush3.bf16.msra.mxu0 %v588_v25  ;;  %v110_v50 = vld [vmem:[#allocation7 + $0x2] ss:$0 sm:$0xff]  ;;  %v111_v58 = vld [vmem:[#allocation7 + $0x3] ss:$0 sm:$0xff]  ;;  %v107_v63 = vld [vmem:[#allocation7] ss:$0 sm:$0xff] }
  0x46   :  { %512 = vmatpush3.bf16.msra.mxu1 %v578_v14  ;;  %540 = vmatprep.subr.bf16.mxu0 %v695_v24 }
  0x47   :  { %513 = vmatprep.subr.bf16.mxu1 %v579_v15 }
  0x49   :  { %541 = vmatpush3.bf16.msra.mxu0 %v589_v26 }
  0x4a   :  { %514 = vmatpush3.bf16.msra.mxu1 %v580_v16  ;;  %542 = vmatprep.subr.bf16.mxu0 %v695_v24 }
  0x4b   :  { %515 = vmatprep.subr.bf16.mxu1 %v581_v17 }
  0x4d   :  { %543 = vmatpush3.bf16.msra.mxu0 %v590_v27 }
  0x4e   :  { %516 = vmatpush3.bf16.msra.mxu1 %v582_v18  ;;  %544 = vmatprep.subr.bf16.mxu0 %v695_v24 }
  0x4f   :  { %517 = vmatprep.subr.bf16.mxu1 %v583_v19 }
  0x51   :  { %545 = vmatpush3.bf16.msra.mxu0 %v591_v28 }
  0x52   :  { %518 = vmatpush3.bf16.msra.mxu1 %v584_v20  ;;  %546 = vmatprep.subr.bf16.mxu0 %v695_v24 }
  0x53   :  { %519 = vmatprep.subr.bf16.mxu1 %v585_v21 }
  0x55   :  { %547 = vmatpush3.bf16.msra.mxu0 %v592_v29 }
  0x56   :  { %520 = vmatpush3.bf16.msra.mxu1 %v586_v22  ;;  %548 = vmatprep.subr.bf16.mxu0 %v695_v24 }
  0x59   :  { %549 = vmatpush3.bf16.msra.mxu0 %v593_v47 }
  0x5a   :  { %550 = vmatprep.subr.bf16.mxu0 %v695_v24 }
  0x5d   :  { %551 = vmatpush3.bf16.msra.mxu0 %v594_v48 }
 0x112   :  { %v182_v37 = vpop.f32.mrb[0].mxu0 }
 0x113   :  { %v183_v38 = vadd.f32 %v182_v37, %v117_v35  ;;  %v184_v39 = vpop.f32.mrb[1].mxu0 }
 0x114   :  { %v185_v40 = vadd.f32 %v184_v39, %v121_v36  ;;  %v186_v41 = vpop.f32.mrb[2].mxu0 }
 0x115   :  { %v189_v42 = vmax.f32 %v183_v38, 0.0  ;;  %v187_v43 = vpop.f32.mrb[3].mxu0 }
 0x116   :  { %v190_v44 = vmax.f32 %v185_v40, 0.0 }
 0x117   :  { %v191_v46 = vpack.c.bf16 %v189_v42, %v189_v42 }
 0x118   :  { %v192_v45 = vpack.c.bf16 %v190_v44, %v190_v44 }
 0x11a   :  { %321 = vmatprep.mubr.bf16.mxu1 %v192_v45 }
 0x11b   :  { %322 = vmatmul.mubr.bf16.vlgmr.msra.gmra.mrb[0].mxu1 %v191_v46 }
 0x1ee   :  { %v521_v49 = vpop.f32.mrb[0].mxu1 }
 0x1ef   :  { %v522_v51 = vpop.f32.mrb[1].mxu1 }
 0x1f0   :  { %v523_v52 = vadd.f32 %v522_v51, %v521_v49  ;;  %v524_v53 = vpop.f32.mrb[2].mxu1 }
 0x1f1   :  { %v525_v54 = vpop.f32.mrb[3].mxu1 }
 0x1f2   :  { %v324_v55 = vadd.f32 %v523_v52, %v110_v50 }
 0x1f4   :  { %v329_v56 = vmax.f32 %v324_v55, 0.0 }
 0x1f6   :  { %v330_v57 = vpack.c.bf16 %v329_v56, %v329_v56 }
 0x1f8   :  { %553 = vmatmul.mubr.bf16.vlgmr.msra.gmra.mrb[4].mxu0 %v330_v57 }
 0x2cb   :  { %v413_v59 = vpop.f32.mrb[4].mxu0 }
 0x2cc   :  { %v414_v60 = vadd.f32 %v413_v59, %v111_v58  ;;  %v554_v61 = vpop.f32.mrb[5].mxu0 }
 0x2cd   :  { %v416_v62 = vpop.f32.mrb[6].mxu0 }
 0x2ce   :  { %v419_v0 = vmax.f32 %v414_v60, 0.0  ;;  %v555_v1 = vpop.f32.mrb[7].mxu0 }
 0x2d0   :  { %v420_v2 = vmul.f32 %v419_v0, %v107_v63 }
 0x2d2   :  { %v422_v3 = vsel %vm421_vm2, %v420_v2, 0.0 }
 0x2d3   :  { %423 = vadd.xlane.f32.xlu0 %v422_v3 }
 0x360   :  { %v424_v5 = vpop.xlane.xlu0 %423 }
 0x361   :  { %v425_v6 = vadd.f32 %v424_v5, %v112_v4 }
 0x363   :  { %426 = vxpose.xlu0.b32.start.end [1/1] (short) (narrow) %v425_v6, 8 }
 0x3e3   :  { %v442_v7 = vpop.trf.xlu0 }
 0x3e4   :  { %459 = vst.msk [vmem:[#allocation8] sm:$0x1] %vm458_vm3, %v442_v7 }
 0x3e5   :  { %672 = shalt.err (!%p669_p0)
}
 0x3e6   :  { %s673_s26 = scalar_lea.hbm %s769_s3, 16 }
 0x3e7   :  { %p674_p1 = scmp.ne.s32.totalorder %s769_s3, %s673_s26  ;;  %p677_p2 = scmp.lt.u32.totalorder %s673_s26, %s769_s3 }
 0x3e9   :  { %p679_p3 = pnand %p677_p2, %p674_p1 }
 0x3eb   :  { %682 = shalt.err (!%p679_p3)
}
 0x3ec   :  { %469 = dma.vmem_to_hbm [thread:$0]  %s467_s21, 16, %s769_s3, [#allocation4]  }
 0x3ed   :  { %687 = dma.done.wait [#allocation4], 16  }
 0x3ee   :  { %688 = vsyncadd [#allocation4], 4294967280 }
 0x3ef   :  { %473 = vsyncpa [#allocation3], 1 }
 0x3f0   :  { %474 = vsyncpa [#allocation6], 1 }
 0x3f1   :  { %475 = vsyncpa [#allocation4], 1 }

</bundles_post_ra>
